<compile_context>
chip_gen: v7x
topology: tpu7x:2x2x1
jax: 0.10.0
libtpu: 0.0.40
codegen_flags: <defaults>
</compile_context>

<pallas_src>
import functools

import jax
import jax.numpy as jnp
from jax.experimental import pallas as pl
from jax.experimental.pallas import tpu as pltpu


def _round_up(n, m):
    return ((n + m - 1) // m) * m


def dqn_kernel(x_ref, w1_ref, b1_ref, w2_ref, b2_ref, o_ref):
    action_d = o_ref.shape[-1]
    # In-kernel bf16 cast of the batch tile (VPU) -- x arrives in its native dtype.
    x = x_ref[...].astype(jnp.bfloat16)
    # fc1: (tb, in) @ (in, hidden) -> f32 accumulation on the MXU.
    h = jnp.dot(x, w1_ref[...], preferred_element_type=jnp.float32)
    h = jnp.maximum(h + b1_ref[...], 0.0)            # bias + ReLU in f32 (VPU)
    # fc2: (tb, hidden) @ (hidden, a_pad) -> f32 accumulation; RHS is lane-padded
    # to 128 so the MXU tile is canonical; only the first action_d lanes are stored.
    out = jnp.dot(h.astype(jnp.bfloat16), w2_ref[...],
                  preferred_element_type=jnp.float32)
    out = out + b2_ref[...]
    o_ref[...] = out[:, :action_d].astype(o_ref.dtype)


def prepare_dqn_params(w1, b1, w2, b2, lane=128):
    """One-time parameter prep (off the per-step hot path).

    Transposes the PyTorch (out_features, in_features) weights to (in, out) so the
    kernel's matmuls contract LHS-last x RHS-first (no in-kernel relayout), casts
    weights to bf16, and zero-pads the fc2 output dim to a multiple of 128 so the
    MXU RHS tile is lane-dense. Biases stay f32.
    """
    hidden_d, input_d = w1.shape
    action_d, _ = w2.shape
    a_pad = _round_up(max(action_d, lane), lane)
    w1_p = jnp.asarray(w1, jnp.bfloat16).T                       # (in, hidden)
    b1_p = jnp.asarray(b1, jnp.float32).reshape(1, hidden_d)     # (1, hidden)
    w2_p = jnp.zeros((hidden_d, a_pad), jnp.bfloat16).at[:, :action_d].set(
        jnp.asarray(w2, jnp.bfloat16).T)                         # (hidden, A_pad)
    b2_p = jnp.zeros((1, a_pad), jnp.float32).at[0, :action_d].set(
        jnp.asarray(b2, jnp.float32))                            # (1, A_pad)
    return (w1_p, b1_p, w2_p, b2_p), action_d


@functools.partial(jax.jit, static_argnames=("action_d",))
def dqn_forward(x, params, action_d):
    """x: (B, input_d) f32/bf16; params from prepare_dqn_params.
    Returns (B, action_d) Q-values in x.dtype (matches the PyTorch forward)."""
    w1_p, b1_p, w2_p, b2_p = params
    B, input_d = x.shape
    hidden_d = w1_p.shape[1]
    a_pad = w2_p.shape[1]

    # Batch tiling: big tiles amortize the ~0.35 us fixed per-grid-step cost; cap
    # the tile so the grid keeps >= 2 "parallel" steps (v7x: 2 TensorCores).
    TARGET_TB = 1024
    if B <= 256:
        tb = _round_up(max(B, 8), 8)          # f32 sublane alignment
        b_pad = tb
    else:
        b128 = _round_up(B, 128)
        tb = min(TARGET_TB, max(128, _round_up(b128 // 2, 128)))
        b_pad = _round_up(B, tb)

    xp = x if b_pad == B else jnp.pad(x, ((0, b_pad - B), (0, 0)))

    # Trace-time VMEM budget check (weights/biases + double-buffered x/out tiles;
    # keep well under v5e's 16 MiB scoped default). Footprint here is < 1 MiB.
    # Note: constant-index weight specs are still double-buffered by default; at
    # hidden_d=256 that is ~160 KB so pipeline_mode=pl.Buffered(1) is skipped.
    itemsize = jnp.dtype(x.dtype).itemsize
    resident_bytes = 2 * (w1_p.size * 2 + w2_p.size * 2
                          + (b1_p.size + b2_p.size) * 4)
    per_step_bytes = 2 * tb * (input_d * itemsize + action_d * 4)
    assert resident_bytes + per_step_bytes < 12 * 1024 * 1024, (
        "DQN kernel tile/weights exceed the conservative VMEM budget")

    flops = 2 * b_pad * (input_d * hidden_d + hidden_d * a_pad)
    bytes_accessed = (b_pad * input_d * itemsize
                      + w1_p.size * 2 + w2_p.size * 2
                      + (b1_p.size + b2_p.size) * 4
                      + b_pad * action_d * 4)

    out = pl.pallas_call(
        dqn_kernel,
        out_shape=jax.ShapeDtypeStruct((b_pad, action_d), x.dtype),
        grid=(b_pad // tb,),
        in_specs=[
            pl.BlockSpec((tb, input_d), lambda i: (i, 0)),         # x: batch-tiled
            pl.BlockSpec((input_d, hidden_d), lambda i: (0, 0)),   # w1: VMEM-resident
            pl.BlockSpec((1, hidden_d), lambda i: (0, 0)),         # b1: VMEM-resident
            pl.BlockSpec((hidden_d, a_pad), lambda i: (0, 0)),     # w2: VMEM-resident
            pl.BlockSpec((1, a_pad), lambda i: (0, 0)),            # b2: VMEM-resident
        ],
        out_specs=pl.BlockSpec((tb, action_d), lambda i: (i, 0)),
        compiler_params=pltpu.CompilerParams(
            dimension_semantics=("parallel",)),
        cost_estimate=pl.CostEstimate(
            flops=flops, transcendentals=0, bytes_accessed=bytes_accessed),
    )(xp, w1_p, b1_p, w2_p, b2_p)

    # TODO(synk): for tiny latency-bound batches the downstream argmax (action
    # selection) could be fused into the kernel and returned as (B,) int32.
    return out if b_pad == B else out[:B]


def init_dqn_params(key, input_d, action_d, hidden_d=256, dtype=jnp.float32):
    """Deterministic PyTorch-style (U[-1/sqrt(fan_in), 1/sqrt(fan_in)]) init."""
    k1, k2, k3, k4 = jax.random.split(key, 4)
    bound1 = 1.0 / (input_d ** 0.5)
    bound2 = 1.0 / (hidden_d ** 0.5)
    w1 = jax.random.uniform(k1, (hidden_d, input_d), dtype, -bound1, bound1)
    b1 = jax.random.uniform(k2, (hidden_d,), dtype, -bound1, bound1)
    w2 = jax.random.uniform(k3, (action_d, hidden_d), dtype, -bound2, bound2)
    b2 = jax.random.uniform(k4, (action_d,), dtype, -bound2, bound2)
    return w1, b1, w2, b2


if __name__ == "__main__":
    key = jax.random.PRNGKey(0)
    k_x, k_x2, k_p = jax.random.split(key, 3)

    input_d, action_d, hidden_d = 32, 8, 256
    w1, b1, w2, b2 = init_dqn_params(k_p, input_d, action_d, hidden_d)
    params, act_d = prepare_dqn_params(w1, b1, w2, b2)

    def ref_fn(xx):  # plain f32 JAX reference (same math as the PyTorch module)
        return jnp.maximum(xx @ w1.T + b1, 0.0) @ w2.T + b2

    # Small-batch path (single grid step).
    x_small = jax.random.normal(k_x, (8, input_d), jnp.float32)
    out_small = jax.block_until_ready(dqn_forward(x_small, params, action_d=act_d))
    assert out_small.shape == (8, action_d)
    assert jnp.allclose(out_small, ref_fn(x_small), atol=3e-2, rtol=3e-2), (
        float(jnp.max(jnp.abs(out_small - ref_fn(x_small)))))

    # Tiled path (non-aligned batch -> pad + 2 parallel grid steps).
    x_big = jax.random.normal(k_x2, (300, input_d), jnp.float32)
    out_big = jax.block_until_ready(dqn_forward(x_big, params, action_d=act_d))
    assert out_big.shape == (300, action_d)
    assert jnp.allclose(out_big, ref_fn(x_big), atol=3e-2, rtol=3e-2), (
        float(jnp.max(jnp.abs(out_big - ref_fn(x_big)))))

    print("KERNEL_OK")
</pallas_src>

<mosaic_0001>
module attributes {stable_mosaic.version = 11 : i64} {
  func.func @dqn_kernel(%arg0: i32, %arg1: memref<8x32xf32, #tpu.memory_space<vmem>>, %arg2: memref<32x256xbf16, #tpu.memory_space<vmem>>, %arg3: memref<1x256xf32, #tpu.memory_space<vmem>>, %arg4: memref<256x128xbf16, #tpu.memory_space<vmem>>, %arg5: memref<1x128xf32, #tpu.memory_space<vmem>>, %arg6: memref<8x8xf32, #tpu.memory_space<vmem>>) attributes {dimension_semantics = [#tpu.dimension_semantics<parallel>], iteration_bounds = array<i64: 1>, scalar_prefetch = 0 : i64, scratch_operands = 0 : i64, tpu.core_type = #tpu.core_type<tc>, window_params = [{transform_indices = @transform_0, window_bounds = array<i64: 8, 32>}, {pipeline_mode = #tpu.pipeline_mode<synchronous>, transform_indices = @transform_1, window_bounds = array<i64: 32, 256>}, {pipeline_mode = #tpu.pipeline_mode<synchronous>, transform_indices = @transform_2, window_bounds = array<i64: 1, 256>}, {pipeline_mode = #tpu.pipeline_mode<synchronous>, transform_indices = @transform_3, window_bounds = array<i64: 256, 128>}, {pipeline_mode = #tpu.pipeline_mode<synchronous>, transform_indices = @transform_4, window_bounds = array<i64: 1, 128>}, {transform_indices = @transform_5, window_bounds = array<i64: 8, 8>}]} {
    %c0 = arith.constant 0 : index
    %c0_0 = arith.constant 0 : index
    %0 = vector.load %arg1[%c0, %c0_0] : memref<8x32xf32, #tpu.memory_space<vmem>>, vector<8x32xf32>
    %1 = arith.truncf %0 : vector<8x32xf32> to vector<8x32xbf16>
    %c0_1 = arith.constant 0 : index
    %c0_2 = arith.constant 0 : index
    %2 = vector.load %arg2[%c0_1, %c0_2] : memref<32x256xbf16, #tpu.memory_space<vmem>>, vector<32x256xbf16>
    %cst = arith.constant dense<0.000000e+00> : vector<8x256xf32>
    %3 = tpu.matmul %1, %2, %cst {dimension_numbers = #tpu.dot_dimension_numbers<[1], [0], [0], [1], [0, 0, 1, 1], [], []>} : vector<8x32xbf16>, vector<32x256xbf16>, vector<8x256xf32> -> vector<8x256xf32>
    %c0_3 = arith.constant 0 : index
    %c0_4 = arith.constant 0 : index
    %4 = vector.load %arg3[%c0_3, %c0_4] : memref<1x256xf32, #tpu.memory_space<vmem>>, vector<1x256xf32>
    %5 = vector.broadcast %4 : vector<1x256xf32> to vector<8x256xf32>
    %6 = arith.addf %3, %5 : vector<8x256xf32>
    %cst_5 = arith.constant 0.000000e+00 : f32
    %7 = vector.broadcast %cst_5 : f32 to vector<8x256xf32>
    %8 = arith.maximumf %6, %7 : vector<8x256xf32>
    %9 = arith.truncf %8 : vector<8x256xf32> to vector<8x256xbf16>
    %c0_6 = arith.constant 0 : index
    %c0_7 = arith.constant 0 : index
    %10 = vector.load %arg4[%c0_6, %c0_7] : memref<256x128xbf16, #tpu.memory_space<vmem>>, vector<256x128xbf16>
    %cst_8 = arith.constant dense<0.000000e+00> : vector<8x128xf32>
    %11 = tpu.matmul %9, %10, %cst_8 {dimension_numbers = #tpu.dot_dimension_numbers<[1], [0], [0], [1], [0, 0, 1, 1], [], []>} : vector<8x256xbf16>, vector<256x128xbf16>, vector<8x128xf32> -> vector<8x128xf32>
    %c0_9 = arith.constant 0 : index
    %c0_10 = arith.constant 0 : index
    %12 = vector.load %arg5[%c0_9, %c0_10] : memref<1x128xf32, #tpu.memory_space<vmem>>, vector<1x128xf32>
    %13 = vector.broadcast %12 : vector<1x128xf32> to vector<8x128xf32>
    %14 = arith.addf %11, %13 : vector<8x128xf32>
    %15 = vector.extract_strided_slice %14 {offsets = [0, 0], sizes = [8, 8], strides = [1, 1]} : vector<8x128xf32> to vector<8x8xf32>
    %c0_11 = arith.constant 0 : index
    %c0_12 = arith.constant 0 : index
    %16 = vector.load %arg6[%c0_11, %c0_12] : memref<8x8xf32, #tpu.memory_space<vmem>>, vector<8x8xf32>
    tpu.vector_store %arg6[%c0_11, %c0_12], %15 {strides = array<i32>} : memref<8x8xf32, #tpu.memory_space<vmem>>, vector<8x8xf32>,
    return
  }
  func.func @transform_0(%arg0: i32) -> (i32, i32) {
    %c0_i32 = arith.constant 0 : i32
    %c0_i32_0 = arith.constant 0 : i32
    return %arg0, %c0_i32 : i32, i32
  }
  func.func @transform_1(%arg0: i32) -> (i32, i32) {
    %c0_i32 = arith.constant 0 : i32
    %c0_i32_0 = arith.constant 0 : i32
    %c0_i32_1 = arith.constant 0 : i32
    return %c0_i32, %c0_i32_0 : i32, i32
  }
  func.func @transform_2(%arg0: i32) -> (i32, i32) {
    %c0_i32 = arith.constant 0 : i32
    %c0_i32_0 = arith.constant 0 : i32
    %c0_i32_1 = arith.constant 0 : i32
    return %c0_i32, %c0_i32_0 : i32, i32
  }
  func.func @transform_3(%arg0: i32) -> (i32, i32) {
    %c0_i32 = arith.constant 0 : i32
    %c0_i32_0 = arith.constant 0 : i32
    %c0_i32_1 = arith.constant 0 : i32
    return %c0_i32, %c0_i32_0 : i32, i32
  }
  func.func @transform_4(%arg0: i32) -> (i32, i32) {
    %c0_i32 = arith.constant 0 : i32
    %c0_i32_0 = arith.constant 0 : i32
    %c0_i32_1 = arith.constant 0 : i32
    return %c0_i32, %c0_i32_0 : i32, i32
  }
  func.func @transform_5(%arg0: i32) -> (i32, i32) {
    %c0_i32 = arith.constant 0 : i32
    %c0_i32_0 = arith.constant 0 : i32
    return %arg0, %c0_i32 : i32, i32
  }
}

</mosaic_0001>

<bundles_post_ra>
// kernel: dqn_forward.1
= control target key start
LH: loop header
LB: loop body
LE: loop exit
PB: predicated region body
PF: predicated region fallthrough
CT: control target
= control target key end

     0   :  { %10 = vsyncpa [#allocation3], 0  ;;  %s603_s0 = inlined_call_operand.hbm [shape: f32[8,32], index: 0, kind: input, shape index: {}]   ;;  %s604_s1 = inlined_call_operand.hbm [shape: bf16[32,256], index: 1, kind: input, shape index: {}]   ;;  %s605_s2 = inlined_call_operand.vmem [shape: f32[1,256], index: 2, kind: input, shape index: {}]   ;;  %s606_s3 = inlined_call_operand.hbm [shape: bf16[256,128], index: 3, kind: input, shape index: {}]   ;;  %s607_s4 = inlined_call_operand.vmem [shape: f32[1,128], index: 4, kind: input, shape index: {}]   ;;  %s608_s5 = inlined_call_operand.hbm [shape: f32[8,8], index: 5, kind: output, shape index: {}]  }
   0x1   :  { %11 = vsyncpa [#allocation6], 0 }
   0x2   :  { %12 = vsyncpa [#allocation4], 0  ;;  %s510_s18 = smov [#allocation5]   ;;  %s416_s22 = scalar_lea.hbm %s604_s1, 512 }
   0x3   :  { %s28_s19 = sshll.u32 %s510_s18, 4  ;;  %p417_p0 = scmp.ne.s32.totalorder %s604_s1, %s416_s22  ;;  %s29_s19 = int_to_ptr.vmem [resolvable:$true] %s28_s19 }
   0x4   :  { %p420_p1 = scmp.lt.u32.totalorder %s416_s22, %s604_s1 }
   0x6   :  { %p422_p2 = pnand %p420_p1, %p417_p0 }
   0x8   :  { %425 = shalt.err (!%p422_p2)
}
   0x9   :  { %s426_s27 = scalar_lea.vmem %s29_s19, 512  ;;  %p431_p4 = scmp.lt.s32.totalorder %s29_s19, %s29_s19 }
   0xa   :  { %p427_p3 = scmp.ne.s32.totalorder %s29_s19, %s426_s27  ;;  %p432_p5 = scmp.lt.s32.totalorder %s426_s27, %s426_s27 }
   0xc   :  { %p433_p6 = por %p432_p5, %p431_p4 }
   0xe   :  { %p434_p7 = pnand %p433_p6, %p427_p3 }
  0x10   :  { %437 = shalt.err (!%p434_p7)
}
  0x11   :  { %s511_s28 = smov 128   ;;  %s512_s29 = smov 8  }
  0x12   :  { %34 = dma.hbm_to_vmem [thread:$0]  %s604_s1, 512, %s29_s19, [#allocation6], %s511_s28, %s511_s28, %s512_s29  }
  0x13   :  { %s513_s7 = smov [#allocation2]   ;;  %s514_s9 = smov [#allocation7]  }
  0x14   :  { %s19_s8 = sshll.u32 %s513_s7, 4  ;;  %s42_s10 = sshll.u32 %s514_s9, 4  ;;  %s20_s8 = int_to_ptr.vmem [resolvable:$true] %s19_s8  ;;  %s43_s10 = int_to_ptr.vmem [resolvable:$true] %s42_s10 }
  0x15   :  { %s438_s13 = scalar_lea.hbm %s603_s0, 128 }
  0x16   :  { %p439_p8 = scmp.ne.s32.totalorder %s603_s0, %s438_s13  ;;  %p442_p9 = scmp.lt.u32.totalorder %s438_s13, %s603_s0 }
  0x18   :  { %p444_p10 = pnand %p442_p9, %p439_p8 }
  0x1a   :  { %447 = shalt.err (!%p444_p10)
}
  0x1b   :  { %s448_s1 = scalar_lea.vmem %s20_s8, 128  ;;  %p453_p12 = scmp.lt.s32.totalorder %s20_s8, %s20_s8 }
  0x1c   :  { %p449_p11 = scmp.ne.s32.totalorder %s20_s8, %s448_s1  ;;  %p454_p13 = scmp.lt.s32.totalorder %s448_s1, %s448_s1 }
  0x1e   :  { %p455_p0 = por %p454_p13, %p453_p12 }
  0x20   :  { %p456_p1 = pnand %p455_p0, %p449_p11 }
  0x22   :  { %459 = shalt.err (!%p456_p1)
}
  0x23   :  { %22 = dma.hbm_to_vmem [thread:$0]  %s603_s0, 128, %s20_s8, [#allocation3]  }
  0x24   :  { %s460_s22 = scalar_lea.hbm %s606_s3, 2048 }
  0x25   :  { %p461_p2 = scmp.ne.s32.totalorder %s606_s3, %s460_s22  ;;  %p464_p3 = scmp.lt.u32.totalorder %s460_s22, %s606_s3 }
  0x27   :  { %p466_p4 = pnand %p464_p3, %p461_p2 }
  0x29   :  { %469 = shalt.err (!%p466_p4)
}
  0x2a   :  { %s470_s27 = scalar_lea.vmem %s43_s10, 2048  ;;  %p475_p6 = scmp.lt.s32.totalorder %s43_s10, %s43_s10 }
  0x2b   :  { %p471_p5 = scmp.ne.s32.totalorder %s43_s10, %s470_s27  ;;  %p476_p7 = scmp.lt.s32.totalorder %s470_s27, %s470_s27 }
  0x2d   :  { %p477_p8 = por %p476_p7, %p475_p6 }
  0x2f   :  { %p478_p9 = pnand %p477_p8, %p471_p5 }
  0x31   :  { %481 = shalt.err (!%p478_p9)
}
  0x32   :  { %s515_s0 = smov 64   ;;  %s516_s28 = smov 4  }
  0x33   :  { %48 = dma.hbm_to_vmem [thread:$0]  %s606_s3, 2048, %s43_s10, [#allocation6], %s515_s0, %s515_s0, %s516_s28  }
  0x34   :  { %504 = dma.done.wait [#allocation3], 128  }
  0x35   :  { %505 = vsyncadd [#allocation3], 4294967168 }
  0x36   :  { %506 = dma.done.wait [#allocation6], 2560  }
  0x37   :  { %507 = vsyncadd [#allocation6], 4294964736  ;;  %v517_v0 = vmov 0   ;;  %v394_v1 = vld [vmem:[#allocation5 + $0x4] ss:$8 sps:$4 sm:$0xff]   ;;  %v61_v5 = vld [vmem:[#allocation2] sm:$0xff]  ;;  %v69_v23 = vlaneseq }
  0x38   :  { %135 = vmatprep.mubr.bf16.mxu0 %v517_v0  ;;  %v396_v2 = vld [vmem:[#allocation5] ss:$8 sps:$4 sm:$0xff]   ;;  %103 = vmatprep.subr.bf16.mxu0 %v394_v1  ;;  %v397_v3 = vld [vmem:[#allocation5 + $0x14] ss:$8 sps:$4 sm:$0xff]   ;;  %v399_v4 = vld [vmem:[#allocation5 + $0x10] ss:$8 sps:$4 sm:$0xff]   ;;  %v62_v9 = vpack.c.bf16 %v61_v5, %v61_v5 }
  0x39   :  { %104 = vmatpush1.bf16.msra.mxu0 %v396_v2  ;;  %v400_v6 = vld [vmem:[#allocation7 + $0x40] sm:$0xff]   ;;  %v402_v8 = vld [vmem:[#allocation7 + $0x48] sm:$0xff]   ;;  %vm99_vm0 = vcmask 261120   ;;  %v404_v11 = vld [vmem:[#allocation7 + $0x50] sm:$0xff]   ;;  %v70_v24 = vshrl.u32 %v69_v23, 7  ;;  %vm323_vm1 = vcmask 64512  }
  0x3a   :  { %105 = vmatprep.subr.bf16.mxu0 %v397_v3  ;;  %v401_v7 = vld [vmem:[#allocation7] sm:$0xff]   ;;  %363 = vmatprep.subr.bf16.mxu1 %v400_v6  ;;  %v403_v10 = vld [vmem:[#allocation7 + $0x8] sm:$0xff]   ;;  %v405_v12 = vld [vmem:[#allocation7 + $0x10] sm:$0xff]  }
  0x3b   :  { %364 = vmatpush3.bf16.msra.mxu1 %v401_v7  ;;  %v406_v13 = vld [vmem:[#allocation7 + $0x58] sm:$0xff]   ;;  %v408_v15 = vld [vmem:[#allocation7 + $0x60] sm:$0xff]   ;;  %v410_v17 = vld [vmem:[#allocation7 + $0x68] sm:$0xff]   ;;  %v71_v25 = vsub.s32 0, %v70_v24  ;;  %v75_v27 = vsub.s32 1, %v70_v24 }
  0x3c   :  { %365 = vmatprep.subr.bf16.mxu1 %v402_v8  ;;  %v407_v14 = vld [vmem:[#allocation7 + $0x18] sm:$0xff]   ;;  %v409_v16 = vld [vmem:[#allocation7 + $0x20] sm:$0xff]   ;;  %v411_v18 = vld [vmem:[#allocation7 + $0x28] sm:$0xff]  }
  0x3d   :  { %106 = vmatpush1.bf16.msra.mxu0 %v399_v4  ;;  %v412_v19 = vld [vmem:[#allocation7 + $0x70] sm:$0xff]   ;;  %v414_v21 = vld [vmem:[#allocation7 + $0x78] sm:$0xff]  }
  0x3e   :  { %v413_v20 = vld [vmem:[#allocation7 + $0x30] sm:$0xff]   ;;  %v415_v22 = vld [vmem:[#allocation7 + $0x38] sm:$0xff]  }
  0x3f   :  { %366 = vmatpush3.bf16.msra.mxu1 %v403_v10  ;;  %v67_v26 = vld [vmem:[%s605_s2] sm:$0x3]  ;;  %s518_s2 = smov [#allocation8]  }
  0x40   :  { %345 = vmatmul.mubr.msk.bf16.vlgmr.msra.gmra.mrb[0].mxu0 %vm99_vm0, %v62_v9  ;;  %367 = vmatprep.subr.bf16.mxu1 %v404_v11  ;;  %v72_v28 = vrot.slane %v67_v26, %v71_v25  ;;  %v76_v29 = vrot.slane %v67_v26, %v75_v27  ;;  %v346_v41 = vld [vmem:[%s607_s4] ss:$0 sm:$0xff]  ;;  %s331_s9 = sshll.u32 %s518_s2, 4  ;;  %s332_s9 = int_to_ptr.vmem [resolvable:$true] %s331_s9 }
  0x41   :  { %s482_s10 = scalar_lea.vmem %s332_s9, 128  ;;  %p487_p11 = scmp.lt.s32.totalorder %s332_s9, %s332_s9 }
  0x42   :  { %p483_p10 = scmp.ne.s32.totalorder %s332_s9, %s482_s10  ;;  %p488_p12 = scmp.lt.s32.totalorder %s482_s10, %s482_s10 }
  0x43   :  { %368 = vmatpush3.bf16.msra.mxu1 %v405_v12 }
  0x44   :  { %369 = vmatprep.subr.bf16.mxu1 %v406_v13  ;;  %p489_p13 = por %p488_p12, %p487_p11 }
  0x46   :  { %p490_p0 = pnand %p489_p13, %p483_p10 }
  0x47   :  { %370 = vmatpush3.bf16.msra.mxu1 %v407_v14 }
  0x48   :  { %371 = vmatprep.subr.bf16.mxu1 %v408_v15 }
  0x4b   :  { %372 = vmatpush3.bf16.msra.mxu1 %v409_v16 }
  0x4c   :  { %373 = vmatprep.subr.bf16.mxu1 %v410_v17 }
  0x4f   :  { %374 = vmatpush3.bf16.msra.mxu1 %v411_v18 }
  0x50   :  { %375 = vmatprep.subr.bf16.mxu1 %v412_v19 }
  0x53   :  { %376 = vmatpush3.bf16.msra.mxu1 %v413_v20 }
  0x54   :  { %377 = vmatprep.subr.bf16.mxu1 %v414_v21 }
  0x57   :  { %378 = vmatpush3.bf16.msra.mxu1 %v415_v22 }
 0x113   :  { %v137_v30 = vpop.f32.mrb[0].mxu0 }
 0x114   :  { %v138_v31 = vadd.f32 %v137_v30, %v72_v28  ;;  %v139_v32 = vpop.f32.mrb[1].mxu0 }
 0x115   :  { %v140_v33 = vadd.f32 %v139_v32, %v76_v29  ;;  %v141_v34 = vpop.f32.mrb[2].mxu0 }
 0x116   :  { %v144_v35 = vmax.f32 %v138_v31, 0.0  ;;  %v142_v36 = vpop.f32.mrb[3].mxu0 }
 0x117   :  { %v145_v37 = vmax.f32 %v140_v33, 0.0 }
 0x118   :  { %v146_v39 = vpack.c.bf16 %v144_v35, %v144_v35 }
 0x119   :  { %v147_v38 = vpack.c.bf16 %v145_v37, %v145_v37 }
 0x11b   :  { %315 = vmatprep.mubr.bf16.mxu1 %v147_v38 }
 0x11c   :  { %316 = vmatmul.mubr.bf16.vlgmr.msra.gmra.mrb[0].mxu1 %v146_v39 }
 0x1ef   :  { %v379_v40 = vpop.f32.mrb[0].mxu1 }
 0x1f0   :  { %v380_v42 = vpop.f32.mrb[1].mxu1 }
 0x1f1   :  { %v381_v43 = vadd.f32 %v380_v42, %v379_v40  ;;  %v382_v44 = vpop.f32.mrb[2].mxu1 }
 0x1f2   :  { %v383_v45 = vpop.f32.mrb[3].mxu1 }
 0x1f3   :  { %v318_v46 = vadd.f32 %v381_v43, %v346_v41 }
 0x1f5   :  { %324 = vst.msk [vmem:[#allocation8] sm:$0xff] %vm323_vm1, %v318_v46 }
 0x1f6   :  { %493 = shalt.err (!%p490_p0)
}
 0x1f7   :  { %s494_s4 = scalar_lea.hbm %s608_s5, 128 }
 0x1f8   :  { %p495_p1 = scmp.ne.s32.totalorder %s608_s5, %s494_s4  ;;  %p498_p2 = scmp.lt.u32.totalorder %s494_s4, %s608_s5 }
 0x1fa   :  { %p500_p3 = pnand %p498_p2, %p495_p1 }
 0x1fc   :  { %503 = shalt.err (!%p500_p3)
}
 0x1fd   :  { %334 = dma.vmem_to_hbm [thread:$0]  %s332_s9, 128, %s608_s5, [#allocation4]  }
 0x1fe   :  { %508 = dma.done.wait [#allocation4], 128  }
 0x1ff   :  { %509 = vsyncadd [#allocation4], 4294967168 }
 0x200   :  { %338 = vsyncpa [#allocation3], 1 }
 0x201   :  { %339 = vsyncpa [#allocation6], 1 }
 0x202   :  { %340 = vsyncpa [#allocation4], 1 }

</bundles_post_ra>
